<compile_context>
chip_gen: v7x
topology: tpu7x:2x2x1
jax: 0.10.0
libtpu: 0.0.40
codegen_flags: <defaults>
</compile_context>

<pallas_src>
import jax
import jax.numpy as jnp
from jax.experimental import pallas as pl
from jax.experimental.pallas import tpu as pltpu


INPUT_SHAPE = 784
HIDDEN_SHAPE = [256, 192, 128, 64]
NUM_LABELS = 10
LAYER_DIMS = [INPUT_SHAPE] + HIDDEN_SHAPE + [NUM_LABELS]  # 5 Linear layers

LANE = 128      # TPU lane width
SUBLANE_BF16 = 16  # bf16 sublane packing: batch tiles must be multiples of 16


def _round_up(n, m):
    return ((n + m - 1) // m) * m


def _cdiv(a, b):
    return (a + b - 1) // b


def _choose_batch_tiling(B, tb_max=1024):
    """Pick (tb, Bp) with tb a multiple of 16 and Bp = n_tiles * tb >= B.

    - Tiny batches: one tile (avoid paying the ~0.35 us/step grid overhead
      twice and avoid padding waste).
    - Otherwise: the smallest EVEN tile count with tiles <= tb_max, so both
      v7x TensorCores get work and large batches still run 512-1024 row tiles
      that amortize per-step pipeline overhead. Padding waste is < one tile.
    """
    Bp = _round_up(max(B, SUBLANE_BF16), SUBLANE_BF16)
    if Bp <= 2 * SUBLANE_BF16:
        return Bp, Bp
    n_tiles = max(2, 2 * _cdiv(Bp, 2 * tb_max))
    tb = _round_up(_cdiv(Bp, n_tiles), SUBLANE_BF16)
    return tb, n_tiles * tb


def mlp_kernel(x_ref,
               w1_ref, b1_ref,
               w2_ref, b2_ref,
               w3_ref, b3_ref,
               w4_ref, b4_ref,
               w5_ref, b5_ref,
               out_ref):
    """One batch tile of the MLP forward.

    Activations and weights are bf16; every matmul accumulates in f32 on the
    MXU; bias add + ReLU happen in f32, then hidden activations are downcast
    back to bf16 (fused with the ReLU) for the next layer."""

    def dense(h_bf16, w_ref, b_ref, relu):
        y = jnp.dot(h_bf16, w_ref[...], preferred_element_type=jnp.float32)
        y = y + b_ref[...]  # (1, out) f32 bias broadcasts over the batch tile
        if relu:
            y = jnp.maximum(y, 0.0).astype(jnp.bfloat16)
        return y

    h = x_ref[...]                                  # bf16, no upcast
    h = dense(h, w1_ref, b1_ref, relu=True)
    h = dense(h, w2_ref, b2_ref, relu=True)
    h = dense(h, w3_ref, b3_ref, relu=True)
    h = dense(h, w4_ref, b4_ref, relu=True)
    h = dense(h, w5_ref, b5_ref, relu=False)        # final Linear, no activation
    out_ref[...] = h.astype(out_ref.dtype)          # bf16 store, lane-dense 128 cols


def prepare_params(params):
    """Cast weights to bf16 and zero-pad feature dims up to multiples of 128.

    params: list of (W, b) with W shaped (in, out) (PyTorch weight transposed)
            and b shaped (1, out), both f32.
    Zero padding is exact: padded bias/weight columns produce zero activations
    (ReLU(0)=0) and padded weight rows contribute nothing downstream.
    """
    prepared = []
    prev_out_pad = params[0][0].shape[0]  # first layer's input dim, unpadded (784)
    for (w, b) in params:
        fan_in, fan_out = w.shape
        in_pad = prev_out_pad
        out_pad = _round_up(fan_out, LANE)
        w_p = jnp.zeros((in_pad, out_pad), jnp.bfloat16)
        w_p = w_p.at[:fan_in, :fan_out].set(w.astype(jnp.bfloat16))
        b_p = jnp.zeros((1, out_pad), jnp.float32)
        b_p = b_p.at[:, :fan_out].set(b.astype(jnp.float32))
        prepared.append((w_p, b_p))
        prev_out_pad = out_pad
    return prepared


def simple_network_forward(x_nchw, params, *, tb_max=1024):
    """x_nchw: (B, C, H, W) float32; params: list of (W_in_out f32, b_1_out f32).

    Returns f32 logits of shape (B, num_labels)."""
    B = x_nchw.shape[0]
    d_in = 1
    for d in x_nchw.shape[1:]:
        d_in *= d
    assert d_in == INPUT_SHAPE

    padded_params = prepare_params(params)
    out_pad = padded_params[-1][0].shape[1]
    true_out = params[-1][0].shape[1]

    tb, Bp = _choose_batch_tiling(B, tb_max=tb_max)

    # Fused reshape -> bf16 cast -> batch pad in a single wrapper pass.
    x_flat = x_nchw.reshape(B, d_in).astype(jnp.bfloat16)
    if Bp != B:
        x_flat = jnp.pad(x_flat, ((0, Bp - B), (0, 0)))

    flat_params = [p for wb in padded_params for p in wb]

    # Activations stream per batch tile; weights/biases use a constant block
    # index so Pallas DMAs them once and keeps them resident in VMEM.
    in_specs = [pl.BlockSpec((tb, d_in), lambda i: (i, 0))]
    for p in flat_params:
        in_specs.append(pl.BlockSpec(p.shape, lambda i: (0, 0)))

    out = pl.pallas_call(
        mlp_kernel,
        out_shape=jax.ShapeDtypeStruct((Bp, out_pad), jnp.bfloat16),
        grid=(Bp // tb,),
        in_specs=in_specs,
        out_specs=pl.BlockSpec((tb, out_pad), lambda i: (i, 0)),
        compiler_params=pltpu.CompilerParams(
            dimension_semantics=("parallel",),   # split batch tiles across TCs (v7x)
            vmem_limit_bytes=32 << 20,           # headroom for tb up to 1024
        ),
    )(x_flat, *flat_params)

    return out[:B, :true_out].astype(jnp.float32)


def init_params(key):
    """Deterministic init mimicking nn.Linear's uniform(-1/sqrt(fan_in), 1/sqrt(fan_in)).

    Weights are stored as (in, out) (i.e. PyTorch weight transposed), f32."""
    params = []
    for i in range(len(LAYER_DIMS) - 1):
        fan_in, fan_out = LAYER_DIMS[i], LAYER_DIMS[i + 1]
        key, kw, kb = jax.random.split(key, 3)
        bound = 1.0 / jnp.sqrt(jnp.float32(fan_in))
        w = jax.random.uniform(kw, (fan_in, fan_out), jnp.float32, -bound, bound)
        b = jax.random.uniform(kb, (1, fan_out), jnp.float32, -bound, bound)
        params.append((w, b))
    return params


def reference_forward(x_nchw, params):
    """Pure-JAX f32 reference of the PyTorch forward (ReLU activation)."""
    h = x_nchw.reshape(x_nchw.shape[0], -1)
    n = len(params)
    for i, (w, b) in enumerate(params):
        h = h @ w + b
        if i < n - 1:
            h = jnp.maximum(h, 0.0)
    return h


if __name__ == "__main__":
    key = jax.random.PRNGKey(0)
    key, kx = jax.random.split(key)

    # MNIST-like input: NCHW (B, 1, 28, 28) -> flatten -> 784 features.
    B = 8
    x = jax.random.normal(kx, (B, 1, 28, 28), dtype=jnp.float32)

    params = init_params(key)

    out = simple_network_forward(x, params)
    out = jax.block_until_ready(out)

    ref = reference_forward(x, params)
    assert out.shape == (B, NUM_LABELS)
    # Tolerance loosened vs. a pure-f32 implementation because weights,
    # streamed activations and stored logits are bf16 (expected precision
    # change, not a bug). Accumulation is still f32.
    assert jnp.allclose(out, ref, atol=5e-2, rtol=5e-2), (
        f"mismatch vs reference, max abs diff {jnp.max(jnp.abs(out - ref))}")

    print("KERNEL_OK")
</pallas_src>

<mosaic_0001>
module attributes {stable_mosaic.version = 11 : i64} {
  func.func @mlp_kernel(%arg0: i32, %arg1: memref<16x784xbf16, #tpu.memory_space<vmem>>, %arg2: memref<784x256xbf16, #tpu.memory_space<vmem>>, %arg3: memref<1x256xf32, #tpu.memory_space<vmem>>, %arg4: memref<256x256xbf16, #tpu.memory_space<vmem>>, %arg5: memref<1x256xf32, #tpu.memory_space<vmem>>, %arg6: memref<256x128xbf16, #tpu.memory_space<vmem>>, %arg7: memref<1x128xf32, #tpu.memory_space<vmem>>, %arg8: memref<128x128xbf16, #tpu.memory_space<vmem>>, %arg9: memref<1x128xf32, #tpu.memory_space<vmem>>, %arg10: memref<128x128xbf16, #tpu.memory_space<vmem>>, %arg11: memref<1x128xf32, #tpu.memory_space<vmem>>, %arg12: memref<16x128xbf16, #tpu.memory_space<vmem>>) attributes {dimension_semantics = [#tpu.dimension_semantics<parallel>], iteration_bounds = array<i64: 1>, scalar_prefetch = 0 : i64, scratch_operands = 0 : i64, tpu.core_type = #tpu.core_type<tc>, window_params = [{transform_indices = @transform_0, window_bounds = array<i64: 16, 784>}, {pipeline_mode = #tpu.pipeline_mode<synchronous>, transform_indices = @transform_1, window_bounds = array<i64: 784, 256>}, {pipeline_mode = #tpu.pipeline_mode<synchronous>, transform_indices = @transform_2, window_bounds = array<i64: 1, 256>}, {pipeline_mode = #tpu.pipeline_mode<synchronous>, transform_indices = @transform_3, window_bounds = array<i64: 256, 256>}, {pipeline_mode = #tpu.pipeline_mode<synchronous>, transform_indices = @transform_4, window_bounds = array<i64: 1, 256>}, {pipeline_mode = #tpu.pipeline_mode<synchronous>, transform_indices = @transform_5, window_bounds = array<i64: 256, 128>}, {pipeline_mode = #tpu.pipeline_mode<synchronous>, transform_indices = @transform_6, window_bounds = array<i64: 1, 128>}, {pipeline_mode = #tpu.pipeline_mode<synchronous>, transform_indices = @transform_7, window_bounds = array<i64: 128, 128>}, {pipeline_mode = #tpu.pipeline_mode<synchronous>, transform_indices = @transform_8, window_bounds = array<i64: 1, 128>}, {pipeline_mode = #tpu.pipeline_mode<synchronous>, transform_indices = @transform_9, window_bounds = array<i64: 128, 128>}, {pipeline_mode = #tpu.pipeline_mode<synchronous>, transform_indices = @transform_10, window_bounds = array<i64: 1, 128>}, {transform_indices = @transform_11, window_bounds = array<i64: 16, 128>}]} {
    %c0 = arith.constant 0 : index
    %c0_0 = arith.constant 0 : index
    %0 = vector.load %arg1[%c0, %c0_0] : memref<16x784xbf16, #tpu.memory_space<vmem>>, vector<16x784xbf16>
    %c0_1 = arith.constant 0 : index
    %c0_2 = arith.constant 0 : index
    %1 = vector.load %arg2[%c0_1, %c0_2] : memref<784x256xbf16, #tpu.memory_space<vmem>>, vector<784x256xbf16>
    %cst = arith.constant dense<0.000000e+00> : vector<16x256xf32>
    %2 = tpu.matmul %0, %1, %cst {dimension_numbers = #tpu.dot_dimension_numbers<[1], [0], [0], [1], [0, 0, 1, 1], [], []>} : vector<16x784xbf16>, vector<784x256xbf16>, vector<16x256xf32> -> vector<16x256xf32>
    %c0_3 = arith.constant 0 : index
    %c0_4 = arith.constant 0 : index
    %3 = vector.load %arg3[%c0_3, %c0_4] : memref<1x256xf32, #tpu.memory_space<vmem>>, vector<1x256xf32>
    %4 = vector.broadcast %3 : vector<1x256xf32> to vector<16x256xf32>
    %5 = arith.addf %2, %4 : vector<16x256xf32>
    %cst_5 = arith.constant 0.000000e+00 : f32
    %6 = vector.broadcast %cst_5 : f32 to vector<16x256xf32>
    %7 = arith.maximumf %5, %6 : vector<16x256xf32>
    %8 = arith.truncf %7 : vector<16x256xf32> to vector<16x256xbf16>
    %c0_6 = arith.constant 0 : index
    %c0_7 = arith.constant 0 : index
    %9 = vector.load %arg4[%c0_6, %c0_7] : memref<256x256xbf16, #tpu.memory_space<vmem>>, vector<256x256xbf16>
    %cst_8 = arith.constant dense<0.000000e+00> : vector<16x256xf32>
    %10 = tpu.matmul %8, %9, %cst_8 {dimension_numbers = #tpu.dot_dimension_numbers<[1], [0], [0], [1], [0, 0, 1, 1], [], []>} : vector<16x256xbf16>, vector<256x256xbf16>, vector<16x256xf32> -> vector<16x256xf32>
    %c0_9 = arith.constant 0 : index
    %c0_10 = arith.constant 0 : index
    %11 = vector.load %arg5[%c0_9, %c0_10] : memref<1x256xf32, #tpu.memory_space<vmem>>, vector<1x256xf32>
    %12 = vector.broadcast %11 : vector<1x256xf32> to vector<16x256xf32>
    %13 = arith.addf %10, %12 : vector<16x256xf32>
    %cst_11 = arith.constant 0.000000e+00 : f32
    %14 = vector.broadcast %cst_11 : f32 to vector<16x256xf32>
    %15 = arith.maximumf %13, %14 : vector<16x256xf32>
    %16 = arith.truncf %15 : vector<16x256xf32> to vector<16x256xbf16>
    %c0_12 = arith.constant 0 : index
    %c0_13 = arith.constant 0 : index
    %17 = vector.load %arg6[%c0_12, %c0_13] : memref<256x128xbf16, #tpu.memory_space<vmem>>, vector<256x128xbf16>
    %cst_14 = arith.constant dense<0.000000e+00> : vector<16x128xf32>
    %18 = tpu.matmul %16, %17, %cst_14 {dimension_numbers = #tpu.dot_dimension_numbers<[1], [0], [0], [1], [0, 0, 1, 1], [], []>} : vector<16x256xbf16>, vector<256x128xbf16>, vector<16x128xf32> -> vector<16x128xf32>
    %c0_15 = arith.constant 0 : index
    %c0_16 = arith.constant 0 : index
    %19 = vector.load %arg7[%c0_15, %c0_16] : memref<1x128xf32, #tpu.memory_space<vmem>>, vector<1x128xf32>
    %20 = vector.broadcast %19 : vector<1x128xf32> to vector<16x128xf32>
    %21 = arith.addf %18, %20 : vector<16x128xf32>
    %cst_17 = arith.constant 0.000000e+00 : f32
    %22 = vector.broadcast %cst_17 : f32 to vector<16x128xf32>
    %23 = arith.maximumf %21, %22 : vector<16x128xf32>
    %24 = arith.truncf %23 : vector<16x128xf32> to vector<16x128xbf16>
    %c0_18 = arith.constant 0 : index
    %c0_19 = arith.constant 0 : index
    %25 = vector.load %arg8[%c0_18, %c0_19] : memref<128x128xbf16, #tpu.memory_space<vmem>>, vector<128x128xbf16>
    %cst_20 = arith.constant dense<0.000000e+00> : vector<16x128xf32>
    %26 = tpu.matmul %24, %25, %cst_20 {dimension_numbers = #tpu.dot_dimension_numbers<[1], [0], [0], [1], [0, 0, 1, 1], [], []>} : vector<16x128xbf16>, vector<128x128xbf16>, vector<16x128xf32> -> vector<16x128xf32>
    %c0_21 = arith.constant 0 : index
    %c0_22 = arith.constant 0 : index
    %27 = vector.load %arg9[%c0_21, %c0_22] : memref<1x128xf32, #tpu.memory_space<vmem>>, vector<1x128xf32>
    %28 = vector.broadcast %27 : vector<1x128xf32> to vector<16x128xf32>
    %29 = arith.addf %26, %28 : vector<16x128xf32>
    %cst_23 = arith.constant 0.000000e+00 : f32
    %30 = vector.broadcast %cst_23 : f32 to vector<16x128xf32>
    %31 = arith.maximumf %29, %30 : vector<16x128xf32>
    %32 = arith.truncf %31 : vector<16x128xf32> to vector<16x128xbf16>
    %c0_24 = arith.constant 0 : index
    %c0_25 = arith.constant 0 : index
    %33 = vector.load %arg10[%c0_24, %c0_25] : memref<128x128xbf16, #tpu.memory_space<vmem>>, vector<128x128xbf16>
    %cst_26 = arith.constant dense<0.000000e+00> : vector<16x128xf32>
    %34 = tpu.matmul %32, %33, %cst_26 {dimension_numbers = #tpu.dot_dimension_numbers<[1], [0], [0], [1], [0, 0, 1, 1], [], []>} : vector<16x128xbf16>, vector<128x128xbf16>, vector<16x128xf32> -> vector<16x128xf32>
    %c0_27 = arith.constant 0 : index
    %c0_28 = arith.constant 0 : index
    %35 = vector.load %arg11[%c0_27, %c0_28] : memref<1x128xf32, #tpu.memory_space<vmem>>, vector<1x128xf32>
    %36 = vector.broadcast %35 : vector<1x128xf32> to vector<16x128xf32>
    %37 = arith.addf %34, %36 : vector<16x128xf32>
    %38 = arith.truncf %37 : vector<16x128xf32> to vector<16x128xbf16>
    %c0_29 = arith.constant 0 : index
    %c0_30 = arith.constant 0 : index
    %39 = vector.load %arg12[%c0_29, %c0_30] : memref<16x128xbf16, #tpu.memory_space<vmem>>, vector<16x128xbf16>
    tpu.vector_store %arg12[%c0_29, %c0_30], %38 {strides = array<i32>} : memref<16x128xbf16, #tpu.memory_space<vmem>>, vector<16x128xbf16>,
    return
  }
  func.func @transform_0(%arg0: i32) -> (i32, i32) {
    %c0_i32 = arith.constant 0 : i32
    %c0_i32_0 = arith.constant 0 : i32
    return %arg0, %c0_i32 : i32, i32
  }
  func.func @transform_1(%arg0: i32) -> (i32, i32) {
    %c0_i32 = arith.constant 0 : i32
    %c0_i32_0 = arith.constant 0 : i32
    %c0_i32_1 = arith.constant 0 : i32
    return %c0_i32, %c0_i32_0 : i32, i32
  }
  func.func @transform_2(%arg0: i32) -> (i32, i32) {
    %c0_i32 = arith.constant 0 : i32
    %c0_i32_0 = arith.constant 0 : i32
    %c0_i32_1 = arith.constant 0 : i32
    return %c0_i32, %c0_i32_0 : i32, i32
  }
  func.func @transform_3(%arg0: i32) -> (i32, i32) {
    %c0_i32 = arith.constant 0 : i32
    %c0_i32_0 = arith.constant 0 : i32
    %c0_i32_1 = arith.constant 0 : i32
    return %c0_i32, %c0_i32_0 : i32, i32
  }
  func.func @transform_4(%arg0: i32) -> (i32, i32) {
    %c0_i32 = arith.constant 0 : i32
    %c0_i32_0 = arith.constant 0 : i32
    %c0_i32_1 = arith.constant 0 : i32
    return %c0_i32, %c0_i32_0 : i32, i32
  }
  func.func @transform_5(%arg0: i32) -> (i32, i32) {
    %c0_i32 = arith.constant 0 : i32
    %c0_i32_0 = arith.constant 0 : i32
    %c0_i32_1 = arith.constant 0 : i32
    return %c0_i32, %c0_i32_0 : i32, i32
  }
  func.func @transform_6(%arg0: i32) -> (i32, i32) {
    %c0_i32 = arith.constant 0 : i32
    %c0_i32_0 = arith.constant 0 : i32
    %c0_i32_1 = arith.constant 0 : i32
    return %c0_i32, %c0_i32_0 : i32, i32
  }
  func.func @transform_7(%arg0: i32) -> (i32, i32) {
    %c0_i32 = arith.constant 0 : i32
    %c0_i32_0 = arith.constant 0 : i32
    %c0_i32_1 = arith.constant 0 : i32
    return %c0_i32, %c0_i32_0 : i32, i32
  }
  func.func @transform_8(%arg0: i32) -> (i32, i32) {
    %c0_i32 = arith.constant 0 : i32
    %c0_i32_0 = arith.constant 0 : i32
    %c0_i32_1 = arith.constant 0 : i32
    return %c0_i32, %c0_i32_0 : i32, i32
  }
  func.func @transform_9(%arg0: i32) -> (i32, i32) {
    %c0_i32 = arith.constant 0 : i32
    %c0_i32_0 = arith.constant 0 : i32
    %c0_i32_1 = arith.constant 0 : i32
    return %c0_i32, %c0_i32_0 : i32, i32
  }
  func.func @transform_10(%arg0: i32) -> (i32, i32) {
    %c0_i32 = arith.constant 0 : i32
    %c0_i32_0 = arith.constant 0 : i32
    %c0_i32_1 = arith.constant 0 : i32
    return %c0_i32, %c0_i32_0 : i32, i32
  }
  func.func @transform_11(%arg0: i32) -> (i32, i32) {
    %c0_i32 = arith.constant 0 : i32
    %c0_i32_0 = arith.constant 0 : i32
    return %arg0, %c0_i32 : i32, i32
  }
}

</mosaic_0001>

<bundles_post_ra>
// kernel: tpu_custom_call.1
= control target key start
LH: loop header
LB: loop body
LE: loop exit
PB: predicated region body
PF: predicated region fallthrough
CT: control target
= control target key end

     0   :  { %16 = vsyncpa [#allocation3], 0  ;;  %s2544_s0 = inlined_call_operand.hbm [shape: bf16[16,784], index: 0, kind: input, shape index: {}]   ;;  %s2545_s1 = inlined_call_operand.hbm [shape: bf16[784,256], index: 1, kind: input, shape index: {}]   ;;  %s2546_s2 = inlined_call_operand.vmem [shape: f32[1,256], index: 2, kind: input, shape index: {}]   ;;  %s2547_s3 = inlined_call_operand.hbm [shape: bf16[256,256], index: 3, kind: input, shape index: {}]   ;;  %s2548_s4 = inlined_call_operand.vmem [shape: f32[1,256], index: 4, kind: input, shape index: {}]   ;;  %s2549_s5 = inlined_call_operand.hbm [shape: bf16[256,128], index: 5, kind: input, shape index: {}]   ;;  %s2550_s6 = inlined_call_operand.vmem [shape: f32[1,128], index: 6, kind: input, shape index: {}]   ;;  %s2551_s7 = inlined_call_operand.hbm [shape: bf16[128,128], index: 7, kind: input, shape index: {}]   ;;  %s2552_s8 = inlined_call_operand.vmem [shape: f32[1,128], index: 8, kind: input, shape index: {}]   ;;  %s2553_s9 = inlined_call_operand.hbm [shape: bf16[128,128], index: 9, kind: input, shape index: {}]   ;;  %s2554_s10 = inlined_call_operand.vmem [shape: f32[1,128], index: 10, kind: input, shape index: {}]   ;;  %s2555_s11 = inlined_call_operand.hbm [shape: bf16[16,128], index: 11, kind: output, shape index: {}]  }
   0x1   :  { %17 = vsyncpa [#allocation6], 0 }
   0x2   :  { %18 = vsyncpa [#allocation9], 0 }
   0x3   :  { %19 = vsyncpa [#allocation12], 0 }
   0x4   :  { %20 = vsyncpa [#allocation4], 0  ;;  %s2331_s17 = smov [#allocation5]   ;;  %s2167_s21 = scalar_lea.hbm %s2545_s1, 12544 }
   0x5   :  { %s38_s18 = sshll.u32 %s2331_s17, 4  ;;  %p2168_p0 = scmp.ne.s32.totalorder %s2545_s1, %s2167_s21  ;;  %s39_s18 = int_to_ptr.vmem [resolvable:$true] %s38_s18 }
   0x6   :  { %p2171_p1 = scmp.lt.u32.totalorder %s2167_s21, %s2545_s1 }
   0x8   :  { %p2173_p2 = pnand %p2171_p1, %p2168_p0 }
   0xa   :  { %2176 = shalt.err (!%p2173_p2)
}
   0xb   :  { %s2177_s26 = scalar_lea.vmem %s39_s18, 12544  ;;  %p2182_p4 = scmp.lt.s32.totalorder %s39_s18, %s39_s18 }
   0xc   :  { %p2178_p3 = scmp.ne.s32.totalorder %s39_s18, %s2177_s26  ;;  %p2183_p5 = scmp.lt.s32.totalorder %s2177_s26, %s2177_s26 }
   0xe   :  { %p2184_p6 = por %p2183_p5, %p2182_p4 }
  0x10   :  { %p2185_p7 = pnand %p2184_p6, %p2178_p3 }
  0x12   :  { %2188 = shalt.err (!%p2185_p7)
}
  0x13   :  { %s2332_s27 = smov 128   ;;  %s2333_s28 = smov 8  }
  0x14   :  { %44 = dma.hbm_to_vmem [thread:$0]  %s2545_s1, 12544, %s39_s18, [#allocation6], %s2332_s27, %s2332_s27, %s2333_s28  }
  0x15   :  { %s2334_s12 = smov [#allocation8]   ;;  %s2189_s16 = scalar_lea.hbm %s2549_s5, 2048 }
  0x16   :  { %s66_s13 = sshll.u32 %s2334_s12, 4  ;;  %p2190_p8 = scmp.ne.s32.totalorder %s2549_s5, %s2189_s16  ;;  %s67_s13 = int_to_ptr.vmem [resolvable:$true] %s66_s13 }
  0x17   :  { %p2193_p9 = scmp.lt.u32.totalorder %s2189_s16, %s2549_s5 }
  0x19   :  { %p2195_p10 = pnand %p2193_p9, %p2190_p8 }
  0x1b   :  { %2198 = shalt.err (!%p2195_p10)
}
  0x1c   :  { %s2199_s22 = scalar_lea.vmem %s67_s13, 2048  ;;  %p2204_p12 = scmp.lt.s32.totalorder %s67_s13, %s67_s13 }
  0x1d   :  { %p2200_p11 = scmp.ne.s32.totalorder %s67_s13, %s2199_s22  ;;  %p2205_p13 = scmp.lt.s32.totalorder %s2199_s22, %s2199_s22 }
  0x1f   :  { %p2206_p0 = por %p2205_p13, %p2204_p12 }
  0x21   :  { %p2207_p1 = pnand %p2206_p0, %p2200_p11 }
  0x23   :  { %2210 = shalt.err (!%p2207_p1)
}
  0x24   :  { %s2335_s1 = smov 64   ;;  %s2336_s18 = smov 4  }
  0x25   :  { %72 = dma.hbm_to_vmem [thread:$0]  %s2549_s5, 2048, %s67_s13, [#allocation9], %s2335_s1, %s2335_s1, %s2336_s18  }
  0x26   :  { %s2337_s25 = smov [#allocation2]   ;;  %s2211_s12 = scalar_lea.hbm %s2544_s0, 896 }
  0x27   :  { %s26_s26 = sshll.u32 %s2337_s25, 4  ;;  %p2212_p2 = scmp.ne.s32.totalorder %s2544_s0, %s2211_s12  ;;  %s27_s26 = int_to_ptr.vmem [resolvable:$true] %s26_s26 }
  0x28   :  { %p2215_p3 = scmp.lt.u32.totalorder %s2211_s12, %s2544_s0 }
  0x2a   :  { %p2217_p4 = pnand %p2215_p3, %p2212_p2 }
  0x2c   :  { %2220 = shalt.err (!%p2217_p4)
}
  0x2d   :  { %s2221_s19 = scalar_lea.vmem %s27_s26, 896  ;;  %p2226_p6 = scmp.lt.s32.totalorder %s27_s26, %s27_s26 }
  0x2e   :  { %p2222_p5 = scmp.ne.s32.totalorder %s27_s26, %s2221_s19  ;;  %p2227_p7 = scmp.lt.s32.totalorder %s2221_s19, %s2221_s19 }
  0x30   :  { %p2228_p8 = por %p2227_p7, %p2226_p6 }
  0x32   :  { %p2229_p9 = pnand %p2228_p8, %p2222_p5 }
  0x34   :  { %2232 = shalt.err (!%p2229_p9)
}
  0x35   :  { %s2338_s5 = smov 448   ;;  %s2339_s13 = smov 28  }
  0x36   :  { %32 = dma.hbm_to_vmem [thread:$0]  %s2544_s0, 896, %s27_s26, [#allocation3], %s2338_s5, %s2338_s5, %s2339_s13  }
  0x37   :  { %s2340_s22 = smov [#allocation7]   ;;  %s2341_s24 = smov [#allocation10]  }
  0x38   :  { %s52_s23 = sshll.u32 %s2340_s22, 4  ;;  %s80_s25 = sshll.u32 %s2341_s24, 4  ;;  %s53_s23 = int_to_ptr.vmem [resolvable:$true] %s52_s23  ;;  %s81_s25 = int_to_ptr.vmem [resolvable:$true] %s80_s25 }
  0x39   :  { %s2233_s12 = scalar_lea.hbm %s2547_s3, 4096 }
  0x3a   :  { %p2234_p10 = scmp.ne.s32.totalorder %s2547_s3, %s2233_s12  ;;  %p2237_p11 = scmp.lt.u32.totalorder %s2233_s12, %s2547_s3 }
  0x3c   :  { %p2239_p12 = pnand %p2237_p11, %p2234_p10 }
  0x3e   :  { %2242 = shalt.err (!%p2239_p12)
}
  0x3f   :  { %s2243_s0 = scalar_lea.vmem %s53_s23, 4096  ;;  %p2248_p0 = scmp.lt.s32.totalorder %s53_s23, %s53_s23 }
  0x40   :  { %p2244_p13 = scmp.ne.s32.totalorder %s53_s23, %s2243_s0  ;;  %p2249_p1 = scmp.lt.s32.totalorder %s2243_s0, %s2243_s0 }
  0x42   :  { %p2250_p2 = por %p2249_p1, %p2248_p0 }
  0x44   :  { %p2251_p3 = pnand %p2250_p2, %p2244_p13 }
  0x46   :  { %2254 = shalt.err (!%p2251_p3)
}
  0x47   :  { %58 = dma.hbm_to_vmem [thread:$0]  %s2547_s3, 4096, %s53_s23, [#allocation6], %s2332_s27, %s2332_s27, %s2333_s28  }
  0x48   :  { %s2255_s20 = scalar_lea.hbm %s2551_s7, 1024 }
  0x49   :  { %p2256_p4 = scmp.ne.s32.totalorder %s2551_s7, %s2255_s20  ;;  %p2259_p5 = scmp.lt.u32.totalorder %s2255_s20, %s2551_s7 }
  0x4b   :  { %p2261_p6 = pnand %p2259_p5, %p2256_p4 }
  0x4d   :  { %2264 = shalt.err (!%p2261_p6)
}
  0x4e   :  { %s2265_s30 = scalar_lea.vmem %s81_s25, 1024  ;;  %p2270_p8 = scmp.lt.s32.totalorder %s81_s25, %s81_s25 }
  0x4f   :  { %p2266_p7 = scmp.ne.s32.totalorder %s81_s25, %s2265_s30  ;;  %p2271_p9 = scmp.lt.s32.totalorder %s2265_s30, %s2265_s30 }
  0x51   :  { %p2272_p10 = por %p2271_p9, %p2270_p8 }
  0x53   :  { %p2273_p11 = pnand %p2272_p10, %p2266_p7 }
  0x55   :  { %2276 = shalt.err (!%p2273_p11)
}
  0x56   :  { %86 = dma.hbm_to_vmem [thread:$0]  %s2551_s7, 1024, %s81_s25, [#allocation9], %s2335_s1, %s2335_s1, %s2336_s18  }
  0x57   :  { %s2342_s28 = smov [#allocation11]   ;;  %s2277_s15 = scalar_lea.hbm %s2553_s9, 1024 }
  0x58   :  { %s94_s23 = sshll.u32 %s2342_s28, 4  ;;  %p2278_p12 = scmp.ne.s32.totalorder %s2553_s9, %s2277_s15  ;;  %s95_s23 = int_to_ptr.vmem [resolvable:$true] %s94_s23 }
  0x59   :  { %p2281_p13 = scmp.lt.u32.totalorder %s2277_s15, %s2553_s9 }
  0x5b   :  { %p2283_p0 = pnand %p2281_p13, %p2278_p12 }
  0x5d   :  { %2286 = shalt.err (!%p2283_p0)
}
  0x5e   :  { %s2287_s19 = scalar_lea.vmem %s95_s23, 1024  ;;  %p2292_p2 = scmp.lt.s32.totalorder %s95_s23, %s95_s23 }
  0x5f   :  { %p2288_p1 = scmp.ne.s32.totalorder %s95_s23, %s2287_s19  ;;  %p2293_p3 = scmp.lt.s32.totalorder %s2287_s19, %s2287_s19 }
  0x61   :  { %p2294_p4 = por %p2293_p3, %p2292_p2 }
  0x63   :  { %p2295_p5 = pnand %p2294_p4, %p2288_p1 }
  0x65   :  { %2298 = shalt.err (!%p2295_p5)
}
  0x66   :  { %100 = dma.hbm_to_vmem [thread:$0]  %s2553_s9, 1024, %s95_s23, [#allocation12], %s2335_s1, %s2335_s1, %s2336_s18  }
  0x67   :  { %2321 = dma.done.wait [#allocation3], 896  }
  0x68   :  { %2322 = vsyncadd [#allocation3], 4294966400 }
  0x69   :  { %2323 = dma.done.wait [#allocation6], 16640  }
  0x6a   :  { %2324 = vsyncadd [#allocation6], 4294950656 }
  0x6b   :  { %2325 = dma.done.wait [#allocation9], 3072  }
  0x6c   :  { %2326 = vsyncadd [#allocation9], 4294964224 }
  0x6d   :  { %2327 = dma.done.wait [#allocation12], 1024  }
  0x6e   :  { %2328 = vsyncadd [#allocation12], 4294966272  ;;  %v1930_v0 = vld [vmem:[#allocation5 + $0x4] ss:$8 sps:$4 sm:$0xff]   ;;  %v1932_v1 = vld [vmem:[#allocation5] ss:$8 sps:$4 sm:$0xff]  }
  0x6f   :  { %769 = vmatprep.subr.bf16.mxu0 %v1930_v0  ;;  %v1933_v2 = vld [vmem:[#allocation5 + $0x14] ss:$8 sps:$4 sm:$0xff]   ;;  %v1935_v3 = vld [vmem:[#allocation5 + $0x10] ss:$8 sps:$4 sm:$0xff]   ;;  %v1936_v4 = vld [vmem:[#allocation5 + $0x24] ss:$8 sps:$4 sm:$0xff]  }
  0x70   :  { %770 = vmatpush1.bf16.msra.mxu0 %v1932_v1  ;;  %v1938_v5 = vld [vmem:[#allocation5 + $0x20] ss:$8 sps:$4 sm:$0xff]   ;;  %v1939_v6 = vld [vmem:[#allocation5 + $0x34] ss:$8 sps:$4 sm:$0xff]   ;;  %v1941_v7 = vld [vmem:[#allocation5 + $0x30] ss:$8 sps:$4 sm:$0xff]  }
  0x71   :  { %771 = vmatprep.subr.bf16.mxu0 %v1933_v2  ;;  %v1942_v8 = vld [vmem:[#allocation5 + $0x44] ss:$8 sps:$4 sm:$0xff]   ;;  %v1944_v9 = vld [vmem:[#allocation5 + $0x40] ss:$8 sps:$4 sm:$0xff]   ;;  %v1945_v10 = vld [vmem:[#allocation5 + $0x54] ss:$8 sps:$4 sm:$0xff]  }
  0x72   :  { %v1947_v11 = vld [vmem:[#allocation5 + $0x50] ss:$8 sps:$4 sm:$0xff]   ;;  %v1948_v12 = vld [vmem:[#allocation5 + $0x64] ss:$8 sps:$4 sm:$0xff]   ;;  %v1950_v14 = vld [vmem:[#allocation5 + $0x60] ss:$8 sps:$4 sm:$0xff]  }
  0x73   :  { %v1980_v13 = vld [vmem:[#allocation2 + $0x4] ss:$28 sps:$4 sm:$0xff]   ;;  %v1951_v15 = vld [vmem:[#allocation5 + $0x74] ss:$8 sps:$4 sm:$0xff]   ;;  %v1953_v16 = vld [vmem:[#allocation5 + $0x70] ss:$8 sps:$4 sm:$0xff]  }
  0x74   :  { %772 = vmatpush1.bf16.msra.mxu0 %v1935_v3  ;;  %801 = vmatprep.mubr.bf16.mxu0 %v1980_v13  ;;  %v1954_v17 = vld [vmem:[#allocation5 + $0x84] ss:$8 sps:$4 sm:$0xff]   ;;  %v1956_v18 = vld [vmem:[#allocation5 + $0x80] ss:$8 sps:$4 sm:$0xff]   ;;  %v1957_v19 = vld [vmem:[#allocation5 + $0x94] ss:$8 sps:$4 sm:$0xff]  }
  0x75   :  { %773 = vmatprep.subr.bf16.mxu0 %v1936_v4  ;;  %v1959_v20 = vld [vmem:[#allocation5 + $0x90] ss:$8 sps:$4 sm:$0xff]   ;;  %v1960_v21 = vld [vmem:[#allocation5 + $0xa4] ss:$8 sps:$4 sm:$0xff]   ;;  %v1962_v22 = vld [vmem:[#allocation5 + $0xa0] ss:$8 sps:$4 sm:$0xff]  }
  0x76   :  { %v1963_v23 = vld [vmem:[#allocation5 + $0xb4] ss:$8 sps:$4 sm:$0xff]   ;;  %v1965_v24 = vld [vmem:[#allocation5 + $0xb0] ss:$8 sps:$4 sm:$0xff]   ;;  %v1966_v25 = vld [vmem:[#allocation5 + $0xc4] ss:$8 sps:$4 sm:$0xff]  }
  0x77   :  { %v1968_v26 = vld [vmem:[#allocation5 + $0xc0] ss:$8 sps:$4 sm:$0xff]   ;;  %v1969_v27 = vld [vmem:[#allocation5 + $0xd4] ss:$8 sps:$4 sm:$0xff]   ;;  %v1971_v28 = vld [vmem:[#allocation5 + $0xd0] ss:$8 sps:$4 sm:$0xff]  }
  0x78   :  { %774 = vmatpush1.bf16.msra.mxu0 %v1938_v5  ;;  %v1972_v29 = vld [vmem:[#allocation5 + $0xe4] ss:$8 sps:$4 sm:$0xff]   ;;  %v1974_v30 = vld [vmem:[#allocation5 + $0xe0] ss:$8 sps:$4 sm:$0xff]   ;;  %v1975_v31 = vld [vmem:[#allocation5 + $0xf4] ss:$8 sps:$4 sm:$0xff]  }
  0x79   :  { %775 = vmatprep.subr.bf16.mxu0 %v1939_v6  ;;  %v1977_v32 = vld [vmem:[#allocation5 + $0xf0] ss:$8 sps:$4 sm:$0xff]   ;;  %v1983_v33 = vld [vmem:[#allocation5 + $0x104] ss:$8 sps:$4 sm:$0xff]   ;;  %v1981_v35 = vld [vmem:[#allocation5 + $0x100] ss:$8 sps:$4 sm:$0xff]  }
  0x7a   :  { %v1978_v34 = vld [vmem:[#allocation2] ss:$28 sps:$4 sm:$0xff]   ;;  %v2031_v36 = vld [vmem:[#allocation2 + $0xc] ss:$28 sps:$4 sm:$0xff]   ;;  %v2343_v38 = vmov 0   ;;  %vm765_vm0 = vcmask 130048  }
  0x7b   :  { %v1986_v37 = vld [vmem:[#allocation5 + $0x114] ss:$8 sps:$4 sm:$0xff]   ;;  %930 = vmatprep.mubr.bf16.mxu1 %v2343_v38  ;;  %v2077_v39 = vld [vmem:[#allocation5 + $0x304] ss:$8 sps:$4 sm:$0xff]   ;;  %v1984_v40 = vld [vmem:[#allocation5 + $0x110] ss:$8 sps:$4 sm:$0xff]  }
  0x7c   :  { %776 = vmatpush1.bf16.msra.mxu0 %v1941_v7  ;;  %v2082_v41 = vld [vmem:[#allocation5 + $0x300] ss:$8 sps:$4 sm:$0xff]   ;;  %v1989_v42 = vld [vmem:[#allocation5 + $0x124] ss:$8 sps:$4 sm:$0xff]   ;;  %898 = vmatprep.subr.bf16.mxu1 %v2077_v39  ;;  %v2087_v45 = vld [vmem:[#allocation7] ss:$8 sps:$4 sm:$0xff]  }
  0x7d   :  { %777 = vmatprep.subr.bf16.mxu0 %v1942_v8  ;;  %v1987_v43 = vld [vmem:[#allocation5 + $0x120] ss:$8 sps:$4 sm:$0xff]   ;;  %899 = vmatpush1.bf16.msra.mxu1 %v2082_v41  ;;  %v2089_v46 = vld [vmem:[#allocation7 + $0x4] ss:$8 sps:$4 sm:$0xff]   ;;  %v2092_v48 = vld [vmem:[#allocation7 + $0x14] ss:$8 sps:$4 sm:$0xff]  }
  0x7e   :  { %v2086_v44 = vld [vmem:[#allocation2 + $0x18] ss:$28 sps:$4 sm:$0xff]   ;;  %1151 = vmatprep.subr.bf16.mxu1 %v2089_v46  ;;  %v1990_v50 = vld [vmem:[#allocation5 + $0x130] ss:$8 sps:$4 sm:$0xff]   ;;  %v1995_v52 = vld [vmem:[#allocation5 + $0x144] ss:$8 sps:$4 sm:$0xff]  }
  0x7f   :  { %v1992_v47 = vld [vmem:[#allocation5 + $0x134] ss:$8 sps:$4 sm:$0xff]   ;;  %v2090_v49 = vld [vmem:[#allocation7 + $0x10] ss:$8 sps:$4 sm:$0xff]   ;;  %v2093_v53 = vld [vmem:[#allocation7 + $0x20] ss:$8 sps:$4 sm:$0xff]  }
  0x80   :  { %778 = vmatpush1.bf16.msra.mxu0 %v1944_v9  ;;  %1741 = vmatmul.mubr.msk.bf16.vlgmr.msra.gmra.mrb[0].mxu1 %vm765_vm0, %v2086_v44  ;;  %v2095_v51 = vld [vmem:[#allocation7 + $0x24] ss:$8 sps:$4 sm:$0xff]   ;;  %v1993_v54 = vld [vmem:[#allocation5 + $0x140] ss:$8 sps:$4 sm:$0xff]   ;;  %v2098_v55 = vld [vmem:[#allocation7 + $0x34] ss:$8 sps:$4 sm:$0xff]  }
  0x81   :  { %779 = vmatprep.subr.bf16.mxu0 %v1945_v10  ;;  %1152 = vmatpush1.bf16.msra.mxu1 %v2087_v45  ;;  %v1998_v56 = vld [vmem:[#allocation5 + $0x154] ss:$8 sps:$4 sm:$0xff]   ;;  %v2096_v57 = vld [vmem:[#allocation7 + $0x30] ss:$8 sps:$4 sm:$0xff]   ;;  %v1996_v58 = vld [vmem:[#allocation5 + $0x150] ss:$8 sps:$4 sm:$0xff]  }
  0x82   :  { %1153 = vmatprep.subr.bf16.mxu1 %v2092_v48  ;;  %v2101_v59 = vld [vmem:[#allocation7 + $0x44] ss:$8 sps:$4 sm:$0xff]   ;;  %v2001_v60 = vld [vmem:[#allocation5 + $0x164] ss:$8 sps:$4 sm:$0xff]   ;;  %v1999_v61 = vld [vmem:[#allocation5 + $0x160] ss:$8 sps:$4 sm:$0xff]  }
  0x83   :  { %v2099_v62 = vld [vmem:[#allocation7 + $0x40] ss:$8 sps:$4 sm:$0xff]   ;;  %v2004_v63 = vld [vmem:[#allocation5 + $0x174] ss:$8 sps:$4 sm:$0xff]   ;;  %v2104_v0 = vld [vmem:[#allocation7 + $0x54] ss:$8 sps:$4 sm:$0xff]  }
  0x84   :  { %780 = vmatpush1.bf16.msra.mxu0 %v1947_v11  ;;  %v2102_v1 = vld [vmem:[#allocation7 + $0x50] ss:$8 sps:$4 sm:$0xff]   ;;  %v2002_v2 = vld [vmem:[#allocation5 + $0x170] ss:$8 sps:$4 sm:$0xff]   ;;  %v2107_v3 = vld [vmem:[#allocation7 + $0x64] ss:$8 sps:$4 sm:$0xff]  }
  0x85   :  { %781 = vmatprep.subr.bf16.mxu0 %v1948_v12  ;;  %1154 = vmatpush1.bf16.msra.mxu1 %v2090_v49  ;;  %v2007_v4 = vld [vmem:[#allocation5 + $0x184] ss:$8 sps:$4 sm:$0xff]   ;;  %v2105_v5 = vld [vmem:[#allocation7 + $0x60] ss:$8 sps:$4 sm:$0xff]   ;;  %v2005_v6 = vld [vmem:[#allocation5 + $0x180] ss:$8 sps:$4 sm:$0xff]  }
  0x86   :  { %1155 = vmatprep.subr.bf16.mxu1 %v2095_v51  ;;  %v2110_v7 = vld [vmem:[#allocation7 + $0x74] ss:$8 sps:$4 sm:$0xff]   ;;  %v2010_v8 = vld [vmem:[#allocation5 + $0x194] ss:$8 sps:$4 sm:$0xff]   ;;  %v2108_v9 = vld [vmem:[#allocation7 + $0x70] ss:$8 sps:$4 sm:$0xff]  }
  0x87   :  { %v2008_v10 = vld [vmem:[#allocation5 + $0x190] ss:$8 sps:$4 sm:$0xff]   ;;  %v2113_v11 = vld [vmem:[#allocation7 + $0x84] ss:$8 sps:$4 sm:$0xff]   ;;  %v2013_v12 = vld [vmem:[#allocation5 + $0x1a4] ss:$8 sps:$4 sm:$0xff]  }
  0x88   :  { %782 = vmatpush1.bf16.msra.mxu0 %v1950_v14  ;;  %v2111_v13 = vld [vmem:[#allocation7 + $0x80] ss:$8 sps:$4 sm:$0xff]   ;;  %v2011_v14 = vld [vmem:[#allocation5 + $0x1a0] ss:$8 sps:$4 sm:$0xff]   ;;  %v2040_v39 = vld [vmem:[#allocation5 + $0x224] ss:$8 sps:$4 sm:$0xff]  }
  0x89   :  { %783 = vmatprep.subr.bf16.mxu0 %v1951_v15  ;;  %1156 = vmatpush1.bf16.msra.mxu1 %v2093_v53  ;;  %v2116_v15 = vld [vmem:[#allocation7 + $0x94] ss:$8 sps:$4 sm:$0xff]   ;;  %v2035_v38 = vld [vmem:[#allocation5 + $0x210] ss:$8 sps:$4 sm:$0xff]   ;;  %v2043_v41 = vld [vmem:[#allocation5 + $0x234] ss:$8 sps:$4 sm:$0xff]  }
  0x8a   :  { %1157 = vmatprep.subr.bf16.mxu1 %v2098_v55  ;;  %v2044_v44 = vld [vmem:[#allocation5 + $0x240] ss:$8 sps:$4 sm:$0xff]   ;;  %v2049_v45 = vld [vmem:[#allocation5 + $0x254] ss:$8 sps:$4 sm:$0xff]   ;;  %v2047_v46 = vld [vmem:[#allocation5 + $0x250] ss:$8 sps:$4 sm:$0xff]  }
  0x8b   :  { %v2050_v48 = vld [vmem:[#allocation5 + $0x260] ss:$8 sps:$4 sm:$0xff]   ;;  %v2055_v49 = vld [vmem:[#allocation5 + $0x274] ss:$8 sps:$4 sm:$0xff]   ;;  %v2058_v51 = vld [vmem:[#allocation5 + $0x284] ss:$8 sps:$4 sm:$0xff]  }
  0x8c   :  { %784 = vmatpush1.bf16.msra.mxu0 %v1953_v16  ;;  %v2016_v16 = vld [vmem:[#allocation5 + $0x1b4] ss:$8 sps:$4 sm:$0xff]   ;;  %v2064_v55 = vld [vmem:[#allocation5 + $0x2a4] ss:$8 sps:$4 sm:$0xff]   ;;  %vm2345_vm1 = vmmov 0   ;;  %s2346_s29 = smov [#allocation13]  }
  0x8d   :  { %785 = vmatprep.subr.bf16.mxu0 %v1954_v17  ;;  %1158 = vmatpush1.bf16.msra.mxu1 %v2096_v57  ;;  %v2114_v17 = vld [vmem:[#allocation7 + $0x90] ss:$8 sps:$4 sm:$0xff]   ;;  %v2061_v53 = vld [vmem:[#allocation5 + $0x294] ss:$8 sps:$4 sm:$0xff]   ;;  %s1621_s30 = sshll.u32 %s2346_s29, 4  ;;  %s1622_s30 = int_to_ptr.vmem [resolvable:$true] %s1621_s30 }
  0x8e   :  { %1159 = vmatprep.subr.bf16.mxu1 %v2101_v59  ;;  %v2067_v57 = vld [vmem:[#allocation5 + $0x2b4] ss:$8 sps:$4 sm:$0xff]   ;;  %v2070_v59 = vld [vmem:[#allocation5 + $0x2c4] ss:$8 sps:$4 sm:$0xff]   ;;  %p2304_p7 = scmp.lt.s32.totalorder %s1622_s30, %s1622_s30 }
  0x90   :  { %786 = vmatpush1.bf16.msra.mxu0 %v1956_v18  ;;  %v2014_v18 = vld [vmem:[#allocation5 + $0x1b0] ss:$8 sps:$4 sm:$0xff]  }
  0x91   :  { %787 = vmatprep.subr.bf16.mxu0 %v1957_v19  ;;  %1160 = vmatpush1.bf16.msra.mxu1 %v2099_v62  ;;  %v2119_v19 = vld [vmem:[#allocation7 + $0xa4] ss:$8 sps:$4 sm:$0xff]   ;;  %v2071_v62 = vld [vmem:[#allocation5 + $0x2d0] ss:$8 sps:$4 sm:$0xff]  }
  0x92   :  { %1161 = vmatprep.subr.bf16.mxu1 %v2104_v0  ;;  %v2074_v0 = vld [vmem:[#allocation5 + $0x2e0] ss:$8 sps:$4 sm:$0xff]  }
  0x94   :  { %788 = vmatpush1.bf16.msra.mxu0 %v1959_v20  ;;  %v2019_v20 = vld [vmem:[#allocation5 + $0x1c4] ss:$8 sps:$4 sm:$0xff]  }
  0x95   :  { %789 = vmatprep.subr.bf16.mxu0 %v1960_v21  ;;  %1162 = vmatpush1.bf16.msra.mxu1 %v2102_v1  ;;  %v2117_v21 = vld [vmem:[#allocation7 + $0xa0] ss:$8 sps:$4 sm:$0xff]   ;;  %v2081_v1 = vld [vmem:[#allocation5 + $0x2f4] ss:$8 sps:$4 sm:$0xff]  }
  0x96   :  { %1163 = vmatprep.subr.bf16.mxu1 %v2107_v3  ;;  %v2083_v3 = vld [vmem:[#allocation2 + $0x10] ss:$28 sps:$4 sm:$0xff]  }
  0x98   :  { %790 = vmatpush1.bf16.msra.mxu0 %v1962_v22  ;;  %v2017_v22 = vld [vmem:[#allocation5 + $0x1c0] ss:$8 sps:$4 sm:$0xff]  }
  0x99   :  { %791 = vmatprep.subr.bf16.mxu0 %v1963_v23  ;;  %1164 = vmatpush1.bf16.msra.mxu1 %v2105_v5  ;;  %v2122_v23 = vld [vmem:[#allocation7 + $0xb4] ss:$8 sps:$4 sm:$0xff]   ;;  %v2126_v5 = vld [vmem:[#allocation7 + $0xd0] ss:$8 sps:$4 sm:$0xff]  }
  0x9a   :  { %1165 = vmatprep.subr.bf16.mxu1 %v2110_v7  ;;  %v2129_v7 = vld [vmem:[#allocation7 + $0xe0] ss:$8 sps:$4 sm:$0xff]  }
  0x9c   :  { %792 = vmatpush1.bf16.msra.mxu0 %v1965_v24  ;;  %v2022_v24 = vld [vmem:[#allocation5 + $0x1d4] ss:$8 sps:$4 sm:$0xff]  }
  0x9d   :  { %793 = vmatprep.subr.bf16.mxu0 %v1966_v25  ;;  %1166 = vmatpush1.bf16.msra.mxu1 %v2108_v9  ;;  %v2120_v25 = vld [vmem:[#allocation7 + $0xb0] ss:$8 sps:$4 sm:$0xff]  }
  0x9e   :  { %1167 = vmatprep.subr.bf16.mxu1 %v2113_v11 }
  0xa0   :  { %794 = vmatpush1.bf16.msra.mxu0 %v1968_v26  ;;  %v2020_v26 = vld [vmem:[#allocation5 + $0x1d0] ss:$8 sps:$4 sm:$0xff]  }
  0xa1   :  { %795 = vmatprep.subr.bf16.mxu0 %v1969_v27  ;;  %1168 = vmatpush1.bf16.msra.mxu1 %v2111_v13  ;;  %v2125_v27 = vld [vmem:[#allocation7 + $0xc4] ss:$8 sps:$4 sm:$0xff]  }
  0xa2   :  { %1169 = vmatprep.subr.bf16.mxu1 %v2116_v15  ;;  %v230_v15 = vlaneseq }
  0xa4   :  { %796 = vmatpush1.bf16.msra.mxu0 %v1971_v28  ;;  %v2025_v28 = vld [vmem:[#allocation5 + $0x1e4] ss:$8 sps:$4 sm:$0xff]  }
  0xa5   :  { %797 = vmatprep.subr.bf16.mxu0 %v1972_v29  ;;  %1170 = vmatpush1.bf16.msra.mxu1 %v2114_v17  ;;  %v2123_v29 = vld [vmem:[#allocation7 + $0xc0] ss:$8 sps:$4 sm:$0xff]  }
  0xa6   :  { %1171 = vmatprep.subr.bf16.mxu1 %v2119_v19 }
  0xa8   :  { %798 = vmatpush1.bf16.msra.mxu0 %v1974_v30  ;;  %v2023_v30 = vld [vmem:[#allocation5 + $0x1e0] ss:$8 sps:$4 sm:$0xff]  }
  0xa9   :  { %799 = vmatprep.subr.bf16.mxu0 %v1975_v31  ;;  %1172 = vmatpush1.bf16.msra.mxu1 %v2117_v21  ;;  %v2028_v31 = vld [vmem:[#allocation5 + $0x1f4] ss:$8 sps:$4 sm:$0xff]  }
  0xaa   :  { %1173 = vmatprep.subr.bf16.mxu1 %v2122_v23 }
  0xac   :  { %800 = vmatpush1.bf16.msra.mxu0 %v1977_v32  ;;  %v2026_v32 = vld [vmem:[#allocation5 + $0x1f0] ss:$8 sps:$4 sm:$0xff]  }
  0xad   :  { %812 = vmatprep.subr.bf16.mxu0 %v1983_v33  ;;  %1174 = vmatpush1.bf16.msra.mxu1 %v2120_v25  ;;  %v2034_v33 = vld [vmem:[#allocation5 + $0x204] ss:$8 sps:$4 sm:$0xff]  }
  0xae   :  { %1175 = vmatprep.subr.bf16.mxu1 %v2125_v27 }
  0xaf   :  { %802 = vmatmul.mubr.bf16.vlgmr.msra.gmra.mrb[0].mxu0 %v1978_v34  ;;  %v2029_v34 = vld [vmem:[#allocation2 + $0x8] ss:$28 sps:$4 sm:$0xff]  }
  0xb0   :  { %813 = vmatpush1.bf16.msra.mxu0 %v1981_v35  ;;  %844 = vmatprep.mubr.bf16.mxu0 %v2031_v36  ;;  %v2032_v35 = vld [vmem:[#allocation5 + $0x200] ss:$8 sps:$4 sm:$0xff]   ;;  %v2085_v36 = vld [vmem:[#allocation2 + $0x14] ss:$28 sps:$4 sm:$0xff]  }
  0xb1   :  { %814 = vmatprep.subr.bf16.mxu0 %v1986_v37  ;;  %1176 = vmatpush1.bf16.msra.mxu1 %v2123_v29  ;;  %v2037_v37 = vld [vmem:[#allocation5 + $0x214] ss:$8 sps:$4 sm:$0xff]  }
  0xb4   :  { %815 = vmatpush1.bf16.msra.mxu0 %v1984_v40  ;;  %v2038_v40 = vld [vmem:[#allocation5 + $0x220] ss:$8 sps:$4 sm:$0xff]  }
  0xb5   :  { %816 = vmatprep.subr.bf16.mxu0 %v1989_v42  ;;  %v2041_v42 = vld [vmem:[#allocation5 + $0x230] ss:$8 sps:$4 sm:$0xff]  }
  0xb8   :  { %817 = vmatpush1.bf16.msra.mxu0 %v1987_v43  ;;  %v2046_v43 = vld [vmem:[#allocation5 + $0x244] ss:$8 sps:$4 sm:$0xff]  }
  0xb9   :  { %818 = vmatprep.subr.bf16.mxu0 %v1992_v47  ;;  %v2052_v47 = vld [vmem:[#allocation5 + $0x264] ss:$8 sps:$4 sm:$0xff]  }
  0xbc   :  { %819 = vmatpush1.bf16.msra.mxu0 %v1990_v50  ;;  %v2053_v50 = vld [vmem:[#allocation5 + $0x270] ss:$8 sps:$4 sm:$0xff]  }
  0xbd   :  { %820 = vmatprep.subr.bf16.mxu0 %v1995_v52  ;;  %v2056_v52 = vld [vmem:[#allocation5 + $0x280] ss:$8 sps:$4 sm:$0xff]  }
  0xc0   :  { %821 = vmatpush1.bf16.msra.mxu0 %v1993_v54  ;;  %v2059_v54 = vld [vmem:[#allocation5 + $0x290] ss:$8 sps:$4 sm:$0xff]  }
  0xc1   :  { %822 = vmatprep.subr.bf16.mxu0 %v1998_v56  ;;  %v2062_v56 = vld [vmem:[#allocation5 + $0x2a0] ss:$8 sps:$4 sm:$0xff]  }
  0xc4   :  { %823 = vmatpush1.bf16.msra.mxu0 %v1996_v58  ;;  %v2065_v58 = vld [vmem:[#allocation5 + $0x2b0] ss:$8 sps:$4 sm:$0xff]  }
  0xc5   :  { %824 = vmatprep.subr.bf16.mxu0 %v2001_v60  ;;  %v2068_v60 = vld [vmem:[#allocation5 + $0x2c0] ss:$8 sps:$4 sm:$0xff]  }
  0xc8   :  { %825 = vmatpush1.bf16.msra.mxu0 %v1999_v61  ;;  %v2073_v61 = vld [vmem:[#allocation5 + $0x2d4] ss:$8 sps:$4 sm:$0xff]  }
  0xc9   :  { %826 = vmatprep.subr.bf16.mxu0 %v2004_v63  ;;  %v2076_v63 = vld [vmem:[#allocation5 + $0x2e4] ss:$8 sps:$4 sm:$0xff]  }
  0xcc   :  { %827 = vmatpush1.bf16.msra.mxu0 %v2002_v2  ;;  %v2079_v2 = vld [vmem:[#allocation5 + $0x2f0] ss:$8 sps:$4 sm:$0xff]  }
  0xcd   :  { %828 = vmatprep.subr.bf16.mxu0 %v2007_v4  ;;  %v2128_v4 = vld [vmem:[#allocation7 + $0xd4] ss:$8 sps:$4 sm:$0xff]  }
  0xce   :  { %1177 = vmatprep.subr.bf16.mxu1 %v2128_v4 }
  0xcf   :  { %1178 = vmatpush1.bf16.msra.mxu1 %v2126_v5 }
  0xd0   :  { %829 = vmatpush1.bf16.msra.mxu0 %v2005_v6  ;;  %v2131_v6 = vld [vmem:[#allocation7 + $0xe4] ss:$8 sps:$4 sm:$0xff]  }
  0xd1   :  { %830 = vmatprep.subr.bf16.mxu0 %v2010_v8  ;;  %1179 = vmatprep.subr.bf16.mxu1 %v2131_v6 }
  0xd3   :  { %1180 = vmatpush1.bf16.msra.mxu1 %v2129_v7 }
  0xd4   :  { %831 = vmatpush1.bf16.msra.mxu0 %v2008_v10  ;;  %v2134_v10 = vld [vmem:[#allocation7 + $0xf4] ss:$8 sps:$4 sm:$0xff]  }
  0xd5   :  { %832 = vmatprep.subr.bf16.mxu0 %v2013_v12  ;;  %v2132_v12 = vld [vmem:[#allocation7 + $0xf0] ss:$8 sps:$4 sm:$0xff]   ;;  %1181 = vmatprep.subr.bf16.mxu1 %v2134_v10  ;;  %v2152_v10 = vld [vmem:[#allocation10 + $0x8] sm:$0xff]  }
  0xd7   :  { %1182 = vmatpush1.bf16.msra.mxu1 %v2132_v12  ;;  %v2154_v12 = vld [vmem:[#allocation10 + $0x18] sm:$0xff]  }
  0xd8   :  { %833 = vmatpush1.bf16.msra.mxu0 %v2011_v14  ;;  %v2135_v14 = vld [vmem:[#allocation8 + $0x40] sm:$0xff]  }
  0xd9   :  { %834 = vmatprep.subr.bf16.mxu0 %v2016_v16  ;;  %1818 = vmatprep.subr.bf16.mxu1 %v2135_v14  ;;  %v231_v16 = vshrl.u32 %v230_v15, 7  ;;  %v2156_v14 = vld [vmem:[#allocation10 + $0x28] sm:$0xff]   ;;  %v2157_v15 = vld [vmem:[#allocation10 + $0x30] sm:$0xff]  }
  0xdb   :  { %v232_v17 = vsub.s32 0, %v231_v16  ;;  %v236_v19 = vsub.s32 1, %v231_v16  ;;  %v2158_v16 = vld [vmem:[#allocation10 + $0x38] sm:$0xff]  }
  0xdc   :  { %835 = vmatpush1.bf16.msra.mxu0 %v2014_v18  ;;  %v228_v18 = vld [vmem:[%s2546_s2] sm:$0x3] }
  0xdd   :  { %836 = vmatprep.subr.bf16.mxu0 %v2019_v20  ;;  %v233_v20 = vrot.slane %v228_v18, %v232_v17  ;;  %v237_v21 = vrot.slane %v228_v18, %v236_v19  ;;  %v1774_v18 = vld [vmem:[%s2550_s6] ss:$0 sm:$0xff] }
  0xe0   :  { %837 = vmatpush1.bf16.msra.mxu0 %v2017_v22 }
  0xe1   :  { %838 = vmatprep.subr.bf16.mxu0 %v2022_v24 }
  0xe4   :  { %839 = vmatpush1.bf16.msra.mxu0 %v2020_v26 }
  0xe5   :  { %840 = vmatprep.subr.bf16.mxu0 %v2025_v28 }
  0xe8   :  { %841 = vmatpush1.bf16.msra.mxu0 %v2023_v30 }
  0xe9   :  { %842 = vmatprep.subr.bf16.mxu0 %v2028_v31 }
  0xec   :  { %843 = vmatpush1.bf16.msra.mxu0 %v2026_v32 }
  0xed   :  { %855 = vmatprep.subr.bf16.mxu0 %v2034_v33 }
  0xef   :  { %845 = vmatmul.mubr.bf16.vlgmr.msra.gmra.mrb[0].mxu0 %v2029_v34 }
  0xf0   :  { %856 = vmatpush1.bf16.msra.mxu0 %v2032_v35  ;;  %887 = vmatprep.mubr.bf16.mxu0 %v2085_v36 }
  0xf1   :  { %857 = vmatprep.subr.bf16.mxu0 %v2037_v37 }
  0xf4   :  { %858 = vmatpush1.bf16.msra.mxu0 %v2035_v38 }
  0xf5   :  { %859 = vmatprep.subr.bf16.mxu0 %v2040_v39 }
  0xf8   :  { %860 = vmatpush1.bf16.msra.mxu0 %v2038_v40  ;;  %v2136_v40 = vld [vmem:[#allocation8] sm:$0xff]  }
  0xf9   :  { %861 = vmatprep.subr.bf16.mxu0 %v2043_v41  ;;  %v2137_v41 = vld [vmem:[#allocation8 + $0x48] sm:$0xff]  }
  0xfc   :  { %862 = vmatpush1.bf16.msra.mxu0 %v2041_v42  ;;  %v2138_v42 = vld [vmem:[#allocation8 + $0x8] sm:$0xff]  }
  0xfd   :  { %863 = vmatprep.subr.bf16.mxu0 %v2046_v43  ;;  %v2139_v43 = vld [vmem:[#allocation8 + $0x50] sm:$0xff]  }
 0x100   :  { %864 = vmatpush1.bf16.msra.mxu0 %v2044_v44  ;;  %v2140_v44 = vld [vmem:[#allocation8 + $0x10] sm:$0xff]  }
 0x101   :  { %865 = vmatprep.subr.bf16.mxu0 %v2049_v45  ;;  %v2141_v45 = vld [vmem:[#allocation8 + $0x58] sm:$0xff]  }
 0x104   :  { %866 = vmatpush1.bf16.msra.mxu0 %v2047_v46  ;;  %v2142_v46 = vld [vmem:[#allocation8 + $0x18] sm:$0xff]  }
 0x105   :  { %867 = vmatprep.subr.bf16.mxu0 %v2052_v47  ;;  %v2143_v47 = vld [vmem:[#allocation8 + $0x60] sm:$0xff]  }
 0x108   :  { %868 = vmatpush1.bf16.msra.mxu0 %v2050_v48  ;;  %v2144_v48 = vld [vmem:[#allocation8 + $0x20] sm:$0xff]  }
 0x109   :  { %869 = vmatprep.subr.bf16.mxu0 %v2055_v49  ;;  %v2145_v49 = vld [vmem:[#allocation8 + $0x68] sm:$0xff]  }
 0x10c   :  { %870 = vmatpush1.bf16.msra.mxu0 %v2053_v50  ;;  %v2146_v50 = vld [vmem:[#allocation8 + $0x28] sm:$0xff]  }
 0x10d   :  { %871 = vmatprep.subr.bf16.mxu0 %v2058_v51  ;;  %v2147_v51 = vld [vmem:[#allocation8 + $0x70] sm:$0xff]  }
 0x110   :  { %872 = vmatpush1.bf16.msra.mxu0 %v2056_v52  ;;  %v2148_v52 = vld [vmem:[#allocation8 + $0x30] sm:$0xff]  }
 0x111   :  { %873 = vmatprep.subr.bf16.mxu0 %v2061_v53  ;;  %v2149_v53 = vld [vmem:[#allocation8 + $0x78] sm:$0xff]  }
 0x114   :  { %874 = vmatpush1.bf16.msra.mxu0 %v2059_v54  ;;  %v2150_v54 = vld [vmem:[#allocation8 + $0x38] sm:$0xff]  }
 0x115   :  { %875 = vmatprep.subr.bf16.mxu0 %v2064_v55  ;;  %v2344_v55 = vmov 0.0  }
 0x118   :  { %876 = vmatpush1.bf16.msra.mxu0 %v2062_v56  ;;  %v979_v56 = vld [vmem:[%s2548_s4] sm:$0x3] }
 0x119   :  { %877 = vmatprep.subr.bf16.mxu0 %v2067_v57  ;;  %v984_v57 = vrot.slane %v979_v56, %v232_v17 }
 0x11c   :  { %878 = vmatpush1.bf16.msra.mxu0 %v2065_v58  ;;  %v988_v58 = vrot.slane %v979_v56, %v236_v19 }
 0x11d   :  { %879 = vmatprep.subr.bf16.mxu0 %v2070_v59 }
 0x120   :  { %880 = vmatpush1.bf16.msra.mxu0 %v2068_v60 }
 0x121   :  { %881 = vmatprep.subr.bf16.mxu0 %v2073_v61 }
 0x124   :  { %882 = vmatpush1.bf16.msra.mxu0 %v2071_v62 }
 0x125   :  { %883 = vmatprep.subr.bf16.mxu0 %v2076_v63 }
 0x128   :  { %884 = vmatpush1.bf16.msra.mxu0 %v2074_v0 }
 0x129   :  { %885 = vmatprep.subr.bf16.mxu0 %v2081_v1 }
 0x12c   :  { %886 = vmatpush1.bf16.msra.mxu0 %v2079_v2 }
 0x12f   :  { %888 = vmatmul.mubr.bf16.vlgmr.msra.gmra.mrb[0].mxu0 %v2083_v3 }
 0x153   :  { %v932_v8 = vpop.f32.mrb[0].mxu1 }
 0x154   :  { %v934_v9 = vpop.f32.mrb[1].mxu1 }
 0x155   :  { %v936_v11 = vpop.f32.mrb[2].mxu1 }
 0x156   :  { %v938_v13 = vpop.f32.mrb[3].mxu1 }
 0x202   :  { %v889_v22 = vpop.f32.mrb[0].mxu0 }
 0x203   :  { %v1898_v23 = vadd.f32 %v889_v22, %v233_v20  ;;  %v891_v24 = vpop.f32.mrb[1].mxu0 }
 0x204   :  { %v1900_v25 = vadd.f32 %v891_v24, %v237_v21  ;;  %v893_v26 = vpop.f32.mrb[2].mxu0 }
 0x205   :  { %v1899_v27 = vadd.f32 %v1898_v23, %v932_v8  ;;  %v1902_v28 = vadd.f32 %v893_v26, %v233_v20  ;;  %v895_v29 = vpop.f32.mrb[3].mxu0 }
 0x206   :  { %v1901_v30 = vadd.f32 %v1900_v25, %v934_v9  ;;  %v1904_v31 = vadd.f32 %v895_v29, %v237_v21  ;;  %v2151_v9 = vld [vmem:[#allocation10] sm:$0xff]  }
 0x207   :  { %v1903_v32 = vadd.f32 %v1902_v28, %v936_v11  ;;  %v941_v34 = vmax.f32 %v1899_v27, 0.0  ;;  %v2153_v11 = vld [vmem:[#allocation10 + $0x10] sm:$0xff]   ;;  %v2159_v28 = vld [vmem:[#allocation11] sm:$0xff]  }
 0x208   :  { %v1905_v33 = vadd.f32 %v1904_v31, %v938_v13  ;;  %v942_v36 = vmax.f32 %v1901_v30, 0.0  ;;  %v2155_v13 = vld [vmem:[#allocation10 + $0x20] sm:$0xff]   ;;  %v2160_v30 = vld [vmem:[#allocation11 + $0x8] sm:$0xff]   ;;  %v2161_v31 = vld [vmem:[#allocation11 + $0x10] sm:$0xff]  }
 0x209   :  { %v943_v35 = vmax.f32 %v1903_v32, 0.0  ;;  %v2162_v32 = vld [vmem:[#allocation11 + $0x18] sm:$0xff]  }
 0x20a   :  { %v944_v37 = vmax.f32 %v1905_v33, 0.0  ;;  %v2163_v33 = vld [vmem:[#allocation11 + $0x20] sm:$0xff]  }
 0x20b   :  { %v945_v38 = vpack.c.bf16 %v943_v35, %v941_v34  ;;  %v2164_v34 = vld [vmem:[#allocation11 + $0x28] sm:$0xff]   ;;  %v2165_v35 = vld [vmem:[#allocation11 + $0x30] sm:$0xff]  }
 0x20c   :  { %v946_v39 = vpack.c.bf16 %v944_v37, %v942_v36  ;;  %v2166_v36 = vld [vmem:[#allocation11 + $0x38] sm:$0xff]  }
 0x20d   :  { %v1791_v37 = vld [vmem:[%s2552_s8] ss:$0 sm:$0xff]  ;;  %s2299_s8 = scalar_lea.vmem %s1622_s30, 128 }
 0x20e   :  { %1183 = vmatprep.mubr.bf16.mxu1 %v946_v39  ;;  %p2300_p6 = scmp.ne.s32.totalorder %s1622_s30, %s2299_s8  ;;  %p2305_p8 = scmp.lt.s32.totalorder %s2299_s8, %s2299_s8 }
 0x20f   :  { %1184 = vmatmul.mubr.bf16.vlgmr.msra.gmra.mrb[4].mxu1 %v945_v38 }
 0x210   :  { %1819 = vmatpush3.bf16.msra.mxu1 %v2136_v40  ;;  %p2306_p9 = por %p2305_p8, %p2304_p7 }
 0x211   :  { %1820 = vmatprep.subr.bf16.mxu1 %v2137_v41 }
 0x212   :  { %p2307_p10 = pnand %p2306_p9, %p2300_p6 }
 0x214   :  { %1821 = vmatpush3.bf16.msra.mxu1 %v2138_v42 }
 0x215   :  { %1822 = vmatprep.subr.bf16.mxu1 %v2139_v43 }
 0x218   :  { %1823 = vmatpush3.bf16.msra.mxu1 %v2140_v44 }
 0x219   :  { %1824 = vmatprep.subr.bf16.mxu1 %v2141_v45 }
 0x21c   :  { %1825 = vmatpush3.bf16.msra.mxu1 %v2142_v46 }
 0x21d   :  { %1826 = vmatprep.subr.bf16.mxu1 %v2143_v47  ;;  %v1800_v47 = vld [vmem:[%s2554_s10] ss:$0 sm:$0xff] }
 0x220   :  { %1827 = vmatpush3.bf16.msra.mxu1 %v2144_v48 }
 0x221   :  { %1828 = vmatprep.subr.bf16.mxu1 %v2145_v49 }
 0x224   :  { %1829 = vmatpush3.bf16.msra.mxu1 %v2146_v50 }
 0x225   :  { %1830 = vmatprep.subr.bf16.mxu1 %v2147_v51 }
 0x228   :  { %1831 = vmatpush3.bf16.msra.mxu1 %v2148_v52 }
 0x229   :  { %1832 = vmatprep.subr.bf16.mxu1 %v2149_v53 }
 0x22c   :  { %1833 = vmatpush3.bf16.msra.mxu1 %v2150_v54 }
 0x22d   :  { %1858 = vmatprep.subr.bf16.mxu1 %v2344_v55 }
 0x2e2   :  { %v1185_v59 = vpop.f32.mrb[4].mxu1 }
 0x2e3   :  { %v1186_v60 = vadd.f32 %v1185_v59, %v984_v57  ;;  %v1187_v61 = vpop.f32.mrb[5].mxu1 }
 0x2e4   :  { %v1188_v62 = vadd.f32 %v1187_v61, %v988_v58  ;;  %v1189_v63 = vpop.f32.mrb[6].mxu1 }
 0x2e5   :  { %v1190_v0 = vadd.f32 %v1189_v63, %v984_v57  ;;  %v1191_v1 = vpop.f32.mrb[7].mxu1  ;;  %v1194_v3 = vmax.f32 %v1186_v60, 0.0 }
 0x2e6   :  { %v1192_v2 = vadd.f32 %v1191_v1, %v988_v58  ;;  %v1195_v5 = vmax.f32 %v1188_v62, 0.0 }
 0x2e7   :  { %v1196_v4 = vmax.f32 %v1190_v0, 0.0 }
 0x2e8   :  { %v1197_v6 = vmax.f32 %v1192_v2, 0.0 }
 0x2e9   :  { %v1198_v7 = vpack.c.bf16 %v1196_v4, %v1194_v3 }
 0x2ea   :  { %v1199_v8 = vpack.c.bf16 %v1197_v6, %v1195_v5 }
 0x2ec   :  { %1367 = vmatprep.mubr.bf16.mxu1 %v1199_v8 }
 0x2ed   :  { %1368 = vmatmul.mubr.bf16.vlgmr.msra.gmra.mrb[8].mxu1 %v1198_v7 }
 0x2ee   :  { %1859 = vmatpush3.bf16.msra.mxu1 %v2151_v9  ;;  %1874 = vmatprep.mubr.msk.bf16.mxu1 %vm2345_vm1, %v2344_v55 }
 0x2ef   :  { %1860 = vmatprep.subr.bf16.mxu1 %v2344_v55 }
 0x2f2   :  { %1861 = vmatpush3.bf16.msra.mxu1 %v2152_v10 }
 0x2f3   :  { %1862 = vmatprep.subr.bf16.mxu1 %v2344_v55 }
 0x2f6   :  { %1863 = vmatpush3.bf16.msra.mxu1 %v2153_v11 }
 0x2f7   :  { %1864 = vmatprep.subr.bf16.mxu1 %v2344_v55 }
 0x2fa   :  { %1865 = vmatpush3.bf16.msra.mxu1 %v2154_v12 }
 0x2fb   :  { %1866 = vmatprep.subr.bf16.mxu1 %v2344_v55 }
 0x2fe   :  { %1867 = vmatpush3.bf16.msra.mxu1 %v2155_v13 }
 0x2ff   :  { %1868 = vmatprep.subr.bf16.mxu1 %v2344_v55 }
 0x302   :  { %1869 = vmatpush3.bf16.msra.mxu1 %v2156_v14 }
 0x303   :  { %1870 = vmatprep.subr.bf16.mxu1 %v2344_v55 }
 0x306   :  { %1871 = vmatpush3.bf16.msra.mxu1 %v2157_v15 }
 0x307   :  { %1872 = vmatprep.subr.bf16.mxu1 %v2344_v55 }
 0x30a   :  { %1873 = vmatpush3.bf16.msra.mxu1 %v2158_v16 }
 0x30b   :  { %1878 = vmatprep.subr.bf16.mxu1 %v2344_v55 }
 0x3c0   :  { %v1834_v17 = vpop.f32.mrb[8].mxu1 }
 0x3c1   :  { %v1835_v19 = vpop.f32.mrb[9].mxu1 }
 0x3c2   :  { %v1836_v20 = vadd.f32 %v1835_v19, %v1834_v17  ;;  %v1837_v21 = vpop.f32.mrb[10].mxu1 }
 0x3c3   :  { %v1838_v22 = vpop.f32.mrb[11].mxu1 }
 0x3c4   :  { %v1370_v23 = vadd.f32 %v1836_v20, %v1774_v18  ;;  %v1839_v24 = vadd.f32 %v1838_v22, %v1837_v21 }
 0x3c6   :  { %v1373_v25 = vadd.f32 %v1839_v24, %v1774_v18  ;;  %v1376_v26 = vmax.f32 %v1370_v23, 0.0 }
 0x3c8   :  { %v1377_v27 = vmax.f32 %v1373_v25, 0.0 }
 0x3ca   :  { %v1378_v29 = vpack.c.bf16 %v1377_v27, %v1376_v26 }
 0x3cc   :  { %1875 = vmatmul.mubr.bf16.vlgmr.msra.gmra.mrb[12].mxu1 %v1378_v29 }
 0x3cd   :  { %1879 = vmatpush3.bf16.msra.mxu1 %v2159_v28  ;;  %1894 = vmatprep.mubr.msk.bf16.mxu1 %vm2345_vm1, %v2344_v55 }
 0x3ce   :  { %1880 = vmatprep.subr.bf16.mxu1 %v2344_v55 }
 0x3d1   :  { %1881 = vmatpush3.bf16.msra.mxu1 %v2160_v30 }
 0x3d2   :  { %1882 = vmatprep.subr.bf16.mxu1 %v2344_v55 }
 0x3d5   :  { %1883 = vmatpush3.bf16.msra.mxu1 %v2161_v31 }
 0x3d6   :  { %1884 = vmatprep.subr.bf16.mxu1 %v2344_v55 }
 0x3d9   :  { %1885 = vmatpush3.bf16.msra.mxu1 %v2162_v32 }
 0x3da   :  { %1886 = vmatprep.subr.bf16.mxu1 %v2344_v55 }
 0x3dd   :  { %1887 = vmatpush3.bf16.msra.mxu1 %v2163_v33 }
 0x3de   :  { %1888 = vmatprep.subr.bf16.mxu1 %v2344_v55 }
 0x3e1   :  { %1889 = vmatpush3.bf16.msra.mxu1 %v2164_v34 }
 0x3e2   :  { %1890 = vmatprep.subr.bf16.mxu1 %v2344_v55 }
 0x3e5   :  { %1891 = vmatpush3.bf16.msra.mxu1 %v2165_v35 }
 0x3e6   :  { %1892 = vmatprep.subr.bf16.mxu1 %v2344_v55 }
 0x3e9   :  { %1893 = vmatpush3.bf16.msra.mxu1 %v2166_v36 }
 0x49f   :  { %v1484_v38 = vpop.f32.mrb[12].mxu1 }
 0x4a0   :  { %v1485_v39 = vadd.f32 %v1791_v37, %v1484_v38  ;;  %v1876_v40 = vpop.f32.mrb[13].mxu1 }
 0x4a1   :  { %v1487_v41 = vpop.f32.mrb[14].mxu1 }
 0x4a2   :  { %v1488_v42 = vadd.f32 %v1791_v37, %v1487_v41  ;;  %v1877_v43 = vpop.f32.mrb[15].mxu1  ;;  %v1491_v44 = vmax.f32 %v1485_v39, 0.0 }
 0x4a4   :  { %v1492_v45 = vmax.f32 %v1488_v42, 0.0 }
 0x4a6   :  { %v1493_v46 = vpack.c.bf16 %v1492_v45, %v1491_v44 }
 0x4a8   :  { %1895 = vmatmul.mubr.bf16.vlgmr.msra.gmra.mrb[16].mxu1 %v1493_v46 }
 0x57b   :  { %v1599_v48 = vpop.f32.mrb[16].mxu1 }
 0x57c   :  { %v1896_v49 = vpop.f32.mrb[17].mxu1  ;;  %v1600_v51 = vadd.f32 %v1800_v47, %v1599_v48 }
 0x57d   :  { %v1602_v50 = vpop.f32.mrb[18].mxu1 }
 0x57e   :  { %v1603_v52 = vadd.f32 %v1800_v47, %v1602_v50  ;;  %v1897_v53 = vpop.f32.mrb[19].mxu1 }
 0x580   :  { %v1816_v54 = vpack.c.bf16 %v1603_v52, %v1600_v51 }
 0x582   :  { %1817 = vst [vmem:[#allocation13] sm:$0xff] %v1816_v54  }
 0x583   :  { %2310 = shalt.err (!%p2307_p10)
}
 0x584   :  { %s2311_s27 = scalar_lea.hbm %s2555_s11, 128 }
 0x585   :  { %p2312_p11 = scmp.ne.s32.totalorder %s2555_s11, %s2311_s27  ;;  %p2315_p12 = scmp.lt.u32.totalorder %s2311_s27, %s2555_s11 }
 0x587   :  { %p2317_p13 = pnand %p2315_p12, %p2312_p11 }
 0x589   :  { %2320 = shalt.err (!%p2317_p13)
}
 0x58a   :  { %1627 = dma.vmem_to_hbm [thread:$0]  %s1622_s30, 128, %s2555_s11, [#allocation4], %s2335_s1, %s2335_s1, %s2336_s18  }
 0x58b   :  { %2329 = dma.done.wait [#allocation4], 128  }
 0x58c   :  { %2330 = vsyncadd [#allocation4], 4294967168 }
 0x58d   :  { %1631 = vsyncpa [#allocation3], 1 }
 0x58e   :  { %1632 = vsyncpa [#allocation6], 1 }
 0x58f   :  { %1633 = vsyncpa [#allocation9], 1 }
 0x590   :  { %1634 = vsyncpa [#allocation12], 1 }
 0x591   :  { %1635 = vsyncpa [#allocation4], 1 }

</bundles_post_ra>
